<compile_context>
chip_gen: v7x
topology: tpu7x:2x2x1
jax: 0.10.0
libtpu: 0.0.40
codegen_flags: <defaults>
</compile_context>

<pallas_src>
import functools

import jax
import jax.numpy as jnp
from jax.experimental import pallas as pl
from jax.experimental.pallas import tpu as pltpu


def _round_up(v, m):
    return ((v + m - 1) // m) * m


def _tlca_kernel(x_ref, pred_ref, o_ref, *, l, cx, cp):
    # Block shapes: x_ref/o_ref (GB, L*Cx, T), pred_ref (GB, L*Cp, T).
    pred = pred_ref[...].astype(jnp.float32)              # (GB, L*Cp, T)

    # Per-clip, numerically-stable softmax over the Cp classes.  L is a small,
    # static extent, so a static Python loop (fully unrolled) keeps the grouped
    # class reductions simple — no in-kernel reshapes of the sublane axis.
    scores = []
    for li in range(l):
        p = pred[:, li * cp:(li + 1) * cp, :]              # (GB, Cp, T)
        m = jnp.max(p, axis=1, keepdims=True)              # (GB, 1, T)
        e = jnp.exp(p - m)                                  # EUP
        inv = pl.reciprocal(jnp.sum(e, axis=1, keepdims=True), approx=True)
        scores.append(e * inv)                              # softmax over classes

    # Mean over the L clips of each batch group.
    mean = scores[0]
    for li in range(1, l):
        mean = mean + scores[li]
    mean = mean * (1.0 / l)                                 # (GB, Cp, T)

    # |score - mean| -> class mean -> per-pixel attention; scale + residual.
    inv_cp = 1.0 / cp
    for li in range(l):
        att = jnp.sum(jnp.abs(scores[li] - mean), axis=1, keepdims=True) * inv_cp
        xs = x_ref[:, li * cx:(li + 1) * cx, :]             # (GB, Cx, T) native dtype
        att_x = xs * att.astype(xs.dtype)                    # matches reference rounding
        o_ref[:, li * cx:(li + 1) * cx, :] = (att_x + xs).astype(o_ref.dtype)


def _vmem_capacity_bytes():
    try:
        return int(pltpu.get_tpu_info().vmem_capacity_bytes)
    except Exception:
        return 64 << 20  # conservative (v7x-safe) fallback


def _select_tiling(b, hw_p, per_lane_group_bytes, traffic_per_lane_group,
                   budget_bytes, target_bytes):
    """Pick (GB batch groups per step, T spatial lanes per step).

    Maximizes min(per-step HBM traffic, target); among configs that reach the
    target, prefers more grid steps (pipelining / megacore sharding) and then
    a wider (lane-denser) spatial tile.  Footprint is enforced jointly on GB*T.
    """
    k = hw_p // 128
    t_cands = [128 * d for d in range(1, k + 1) if k % d == 0]
    gb_cands = [g for g in range(1, b + 1) if b % g == 0]
    best = None
    for gb in gb_cands:
        for t in t_cands:
            if gb * t * per_lane_group_bytes > budget_bytes:
                continue
            traffic = gb * t * traffic_per_lane_group
            steps = (b // gb) * (hw_p // t)
            score = (min(traffic, target_bytes), steps, t)
            if best is None or score > best[0]:
                best = (score, gb, t)
    if best is None:
        # Even the minimal block exceeds the budget (extreme L*C); fall back to
        # the smallest legal block and let vmem_limit grow to cover it.
        return 1, 128
    return best[1], best[2]


def tlca_pallas(x, pred, b):
    """x: (B*L, Cx, H, W), pred: (B*L, Cp, H, W), b: python int batch count."""
    n, cx, h, w = x.shape
    n2, cp, h2, w2 = pred.shape
    assert n == n2 and h == h2 and w == w2
    assert n % b == 0
    l = n // b
    hw = h * w
    hw_p = _round_up(hw, 128)

    # Merge L*C onto the sublane axis (free, contiguous reshape in HBM).
    x3 = x.reshape(b, l * cx, hw)
    p3 = pred.reshape(b, l * cp, hw)
    if hw_p != hw:
        # Pad the flattened spatial axis once in HBM so every lane block is a
        # dense multiple of 128 (unmasked output stores).  Zero-padded columns
        # produce a uniform softmax and zero attention -> sliced off below.
        x3 = jnp.pad(x3, ((0, 0), (0, 0), (0, hw_p - hw)))
        p3 = jnp.pad(p3, ((0, 0), (0, 0), (0, hw_p - hw)))

    isz_x = x.dtype.itemsize
    isz_p = pred.dtype.itemsize
    sub_x = max(8, 32 // isz_x)          # sublane tile rows for x dtype
    sub_p = max(8, 32 // isz_p)
    rows_x = _round_up(l * cx, sub_x)
    rows_p = _round_up(l * cp, sub_p)

    # Per (batch-group, lane-column) VMEM footprint: double-buffered x/out/pred
    # blocks + the f32 working set (per-clip scores, clip mean, temporaries).
    io_bytes = 2 * (2 * rows_x * isz_x + rows_p * isz_p)
    work_bytes = (l + 2) * _round_up(cp, 8) * 4 + 6 * 8 * 4
    per_lane_group = io_bytes + work_bytes
    # HBM traffic per (batch-group, lane-column): read x, write out, read pred.
    traffic_per_lane_group = 2 * l * cx * isz_x + l * cp * isz_p

    capacity = _vmem_capacity_bytes()
    hard_cap = min(capacity * 3 // 4, 64 << 20)   # 48 MiB on v7x, 64 MiB on v5e/v6e
    budget = hard_cap // 2
    # Per-step traffic target: v7x's 3.2 TB/s hides ~1.1 MB under the ~0.35 us
    # step overhead, so aim higher there; ~2 MB is enough on v5e/v6e.
    target = (4 << 20) if capacity <= (64 << 20) else (2 << 20)

    gb, t = _select_tiling(b, hw_p, per_lane_group, traffic_per_lane_group,
                           budget, target)
    foot = gb * t * per_lane_group
    vmem_limit = int(min(max(hard_cap, foot * 3 // 2), capacity * 3 // 4))
    vmem_limit = max(vmem_limit, 24 << 20)

    grid = (b // gb, hw_p // t)

    kernel = functools.partial(_tlca_kernel, l=l, cx=cx, cp=cp)

    cost = pl.CostEstimate(
        flops=int(8 * b * l * cp * hw_p + 2 * b * l * cx * hw_p),
        transcendentals=int(b * l * (cp + 1) * hw_p),
        bytes_accessed=int(b * hw_p * traffic_per_lane_group),
    )

    out = pl.pallas_call(
        kernel,
        out_shape=jax.ShapeDtypeStruct((b, l * cx, hw_p), x.dtype),
        grid_spec=pltpu.PrefetchScalarGridSpec(
            num_scalar_prefetch=0,
            grid=grid,
            in_specs=[
                pl.BlockSpec((gb, l * cx, t), lambda i, j: (i, 0, j)),
                pl.BlockSpec((gb, l * cp, t), lambda i, j: (i, 0, j)),
            ],
            out_specs=pl.BlockSpec((gb, l * cx, t), lambda i, j: (i, 0, j)),
        ),
        compiler_params=pltpu.CompilerParams(
            dimension_semantics=("parallel", "parallel"),
            vmem_limit_bytes=vmem_limit,
        ),
        cost_estimate=cost,
    )(x3, p3)

    if hw_p != hw:
        out = out[:, :, :hw]
    return out.reshape(n, cx, h, w)


def tlca_reference(x, pred, b):
    """Pure-JAX reference mirroring the PyTorch forward."""
    n, cx, h, w = x.shape
    l = n // b
    score = jax.nn.softmax(pred.astype(jnp.float32), axis=1)
    score = score.reshape(b, l, -1, h, w)
    dist_mean = jnp.mean(score, axis=1, keepdims=True)
    att = jnp.abs(score - dist_mean).reshape(n, -1, h, w)
    att_avg = jnp.mean(att, axis=1, keepdims=True)
    return (x * att_avg.astype(x.dtype) + x).astype(x.dtype)


if __name__ == "__main__":
    key = jax.random.PRNGKey(0)
    kx, kp = jax.random.split(key)

    # Small shapes consistent with the module: b batch groups of l clips each,
    # x has Cx feature channels, pred has Cp class channels, spatial 16x16.
    b, l = 2, 4
    n = b * l
    cx, cp = 4, 3
    h = w = 16

    x = jax.random.normal(kx, (n, cx, h, w), jnp.float32)
    pred = jax.random.normal(kp, (n, cp, h, w), jnp.float32)

    y = jax.block_until_ready(tlca_pallas(x, pred, b))
    y_ref = tlca_reference(x, pred, b)

    assert y.shape == (n, cx, h, w)
    # approx=True EUP reciprocal in the softmax -> ~1e-3-scale deviation vs the
    # exact-divide reference; tolerance chosen accordingly.
    err = float(jnp.max(jnp.abs(y - y_ref)))
    assert jnp.allclose(y, y_ref, atol=5e-3, rtol=5e-3), f"max abs err = {err}"

    print("KERNEL_OK")
</pallas_src>

<mosaic_0001>
module attributes {stable_mosaic.version = 11 : i64} {
  func.func @_tlca_kernel(%arg0: i32, %arg1: i32, %arg2: memref<2x16x256xf32, #tpu.memory_space<vmem>>, %arg3: memref<2x12x256xf32, #tpu.memory_space<vmem>>, %arg4: memref<2x16x256xf32, #tpu.memory_space<vmem>>) attributes {dimension_semantics = [#tpu.dimension_semantics<parallel>, #tpu.dimension_semantics<parallel>], iteration_bounds = array<i64: 1, 1>, scalar_prefetch = 0 : i64, scratch_operands = 0 : i64, tpu.core_type = #tpu.core_type<tc>, window_params = [{transform_indices = @transform_0, window_bounds = array<i64: 2, 16, 256>}, {transform_indices = @transform_1, window_bounds = array<i64: 2, 12, 256>}, {transform_indices = @transform_2, window_bounds = array<i64: 2, 16, 256>}]} {
    %c0 = arith.constant 0 : index
    %c0_0 = arith.constant 0 : index
    %c0_1 = arith.constant 0 : index
    %0 = vector.load %arg3[%c0, %c0_0, %c0_1] : memref<2x12x256xf32, #tpu.memory_space<vmem>>, vector<2x12x256xf32>
    %1 = vector.extract_strided_slice %0 {offsets = [0, 0, 0], sizes = [2, 3, 256], strides = [1, 1, 1]} : vector<2x12x256xf32> to vector<2x3x256xf32>
    %cst = arith.constant dense<0xFF800000> : vector<2x256xf32>
    %2 = vector.multi_reduction <maximumf>, %1, %cst [1] : vector<2x3x256xf32> to vector<2x256xf32>
    %3 = vector.shape_cast %2 : vector<2x256xf32> to vector<2x1x256xf32>
    %4 = vector.broadcast %3 : vector<2x1x256xf32> to vector<2x3x256xf32>
    %5 = arith.subf %1, %4 : vector<2x3x256xf32>
    %6 = math.exp %5 : vector<2x3x256xf32>
    %cst_2 = arith.constant dense<0.000000e+00> : vector<2x256xf32>
    %7 = vector.multi_reduction <add>, %6, %cst_2 [1] : vector<2x3x256xf32> to vector<2x256xf32>
    %8 = vector.shape_cast %7 : vector<2x256xf32> to vector<2x1x256xf32>
    %9 = tpu.reciprocal %8 {approx = true} : vector<2x1x256xf32> -> vector<2x1x256xf32>
    %10 = vector.broadcast %9 : vector<2x1x256xf32> to vector<2x3x256xf32>
    %11 = arith.mulf %6, %10 : vector<2x3x256xf32>
    %12 = vector.extract_strided_slice %0 {offsets = [0, 3, 0], sizes = [2, 3, 256], strides = [1, 1, 1]} : vector<2x12x256xf32> to vector<2x3x256xf32>
    %cst_3 = arith.constant dense<0xFF800000> : vector<2x256xf32>
    %13 = vector.multi_reduction <maximumf>, %12, %cst_3 [1] : vector<2x3x256xf32> to vector<2x256xf32>
    %14 = vector.shape_cast %13 : vector<2x256xf32> to vector<2x1x256xf32>
    %15 = vector.broadcast %14 : vector<2x1x256xf32> to vector<2x3x256xf32>
    %16 = arith.subf %12, %15 : vector<2x3x256xf32>
    %17 = math.exp %16 : vector<2x3x256xf32>
    %cst_4 = arith.constant dense<0.000000e+00> : vector<2x256xf32>
    %18 = vector.multi_reduction <add>, %17, %cst_4 [1] : vector<2x3x256xf32> to vector<2x256xf32>
    %19 = vector.shape_cast %18 : vector<2x256xf32> to vector<2x1x256xf32>
    %20 = tpu.reciprocal %19 {approx = true} : vector<2x1x256xf32> -> vector<2x1x256xf32>
    %21 = vector.broadcast %20 : vector<2x1x256xf32> to vector<2x3x256xf32>
    %22 = arith.mulf %17, %21 : vector<2x3x256xf32>
    %23 = vector.extract_strided_slice %0 {offsets = [0, 6, 0], sizes = [2, 3, 256], strides = [1, 1, 1]} : vector<2x12x256xf32> to vector<2x3x256xf32>
    %cst_5 = arith.constant dense<0xFF800000> : vector<2x256xf32>
    %24 = vector.multi_reduction <maximumf>, %23, %cst_5 [1] : vector<2x3x256xf32> to vector<2x256xf32>
    %25 = vector.shape_cast %24 : vector<2x256xf32> to vector<2x1x256xf32>
    %26 = vector.broadcast %25 : vector<2x1x256xf32> to vector<2x3x256xf32>
    %27 = arith.subf %23, %26 : vector<2x3x256xf32>
    %28 = math.exp %27 : vector<2x3x256xf32>
    %cst_6 = arith.constant dense<0.000000e+00> : vector<2x256xf32>
    %29 = vector.multi_reduction <add>, %28, %cst_6 [1] : vector<2x3x256xf32> to vector<2x256xf32>
    %30 = vector.shape_cast %29 : vector<2x256xf32> to vector<2x1x256xf32>
    %31 = tpu.reciprocal %30 {approx = true} : vector<2x1x256xf32> -> vector<2x1x256xf32>
    %32 = vector.broadcast %31 : vector<2x1x256xf32> to vector<2x3x256xf32>
    %33 = arith.mulf %28, %32 : vector<2x3x256xf32>
    %34 = vector.extract_strided_slice %0 {offsets = [0, 9, 0], sizes = [2, 3, 256], strides = [1, 1, 1]} : vector<2x12x256xf32> to vector<2x3x256xf32>
    %cst_7 = arith.constant dense<0xFF800000> : vector<2x256xf32>
    %35 = vector.multi_reduction <maximumf>, %34, %cst_7 [1] : vector<2x3x256xf32> to vector<2x256xf32>
    %36 = vector.shape_cast %35 : vector<2x256xf32> to vector<2x1x256xf32>
    %37 = vector.broadcast %36 : vector<2x1x256xf32> to vector<2x3x256xf32>
    %38 = arith.subf %34, %37 : vector<2x3x256xf32>
    %39 = math.exp %38 : vector<2x3x256xf32>
    %cst_8 = arith.constant dense<0.000000e+00> : vector<2x256xf32>
    %40 = vector.multi_reduction <add>, %39, %cst_8 [1] : vector<2x3x256xf32> to vector<2x256xf32>
    %41 = vector.shape_cast %40 : vector<2x256xf32> to vector<2x1x256xf32>
    %42 = tpu.reciprocal %41 {approx = true} : vector<2x1x256xf32> -> vector<2x1x256xf32>
    %43 = vector.broadcast %42 : vector<2x1x256xf32> to vector<2x3x256xf32>
    %44 = arith.mulf %39, %43 : vector<2x3x256xf32>
    %45 = arith.addf %11, %22 : vector<2x3x256xf32>
    %46 = arith.addf %45, %33 : vector<2x3x256xf32>
    %47 = arith.addf %46, %44 : vector<2x3x256xf32>
    %cst_9 = arith.constant 2.500000e-01 : f32
    %48 = vector.broadcast %cst_9 : f32 to vector<2x3x256xf32>
    %49 = arith.mulf %47, %48 : vector<2x3x256xf32>
    %50 = arith.subf %11, %49 : vector<2x3x256xf32>
    %51 = math.absf %50 : vector<2x3x256xf32>
    %cst_10 = arith.constant dense<0.000000e+00> : vector<2x256xf32>
    %52 = vector.multi_reduction <add>, %51, %cst_10 [1] : vector<2x3x256xf32> to vector<2x256xf32>
    %53 = vector.shape_cast %52 : vector<2x256xf32> to vector<2x1x256xf32>
    %cst_11 = arith.constant 0.333333343 : f32
    %54 = vector.broadcast %cst_11 : f32 to vector<2x1x256xf32>
    %55 = arith.mulf %53, %54 : vector<2x1x256xf32>
    %c0_12 = arith.constant 0 : index
    %c0_13 = arith.constant 0 : index
    %c0_14 = arith.constant 0 : index
    %56 = vector.load %arg2[%c0_12, %c0_13, %c0_14] : memref<2x16x256xf32, #tpu.memory_space<vmem>>, vector<2x4x256xf32>
    %57 = vector.broadcast %55 : vector<2x1x256xf32> to vector<2x4x256xf32>
    %58 = arith.mulf %56, %57 : vector<2x4x256xf32>
    %59 = arith.addf %58, %56 : vector<2x4x256xf32>
    %c0_15 = arith.constant 0 : index
    %c0_16 = arith.constant 0 : index
    %c0_17 = arith.constant 0 : index
    %60 = vector.load %arg4[%c0_15, %c0_16, %c0_17] : memref<2x16x256xf32, #tpu.memory_space<vmem>>, vector<2x4x256xf32>
    tpu.vector_store %arg4[%c0_15, %c0_16, %c0_17], %59 {strides = array<i32>} : memref<2x16x256xf32, #tpu.memory_space<vmem>>, vector<2x4x256xf32>,
    %61 = arith.subf %22, %49 : vector<2x3x256xf32>
    %62 = math.absf %61 : vector<2x3x256xf32>
    %cst_18 = arith.constant dense<0.000000e+00> : vector<2x256xf32>
    %63 = vector.multi_reduction <add>, %62, %cst_18 [1] : vector<2x3x256xf32> to vector<2x256xf32>
    %64 = vector.shape_cast %63 : vector<2x256xf32> to vector<2x1x256xf32>
    %cst_19 = arith.constant 0.333333343 : f32
    %65 = vector.broadcast %cst_19 : f32 to vector<2x1x256xf32>
    %66 = arith.mulf %64, %65 : vector<2x1x256xf32>
    %c0_20 = arith.constant 0 : index
    %c4 = arith.constant 4 : index
    %c0_21 = arith.constant 0 : index
    %67 = vector.load %arg2[%c0_20, %c4, %c0_21] : memref<2x16x256xf32, #tpu.memory_space<vmem>>, vector<2x4x256xf32>
    %68 = vector.broadcast %66 : vector<2x1x256xf32> to vector<2x4x256xf32>
    %69 = arith.mulf %67, %68 : vector<2x4x256xf32>
    %70 = arith.addf %69, %67 : vector<2x4x256xf32>
    %c0_22 = arith.constant 0 : index
    %c4_23 = arith.constant 4 : index
    %c0_24 = arith.constant 0 : index
    %71 = vector.load %arg4[%c0_22, %c4_23, %c0_24] : memref<2x16x256xf32, #tpu.memory_space<vmem>>, vector<2x4x256xf32>
    tpu.vector_store %arg4[%c0_22, %c4_23, %c0_24], %70 {strides = array<i32>} : memref<2x16x256xf32, #tpu.memory_space<vmem>>, vector<2x4x256xf32>,
    %72 = arith.subf %33, %49 : vector<2x3x256xf32>
    %73 = math.absf %72 : vector<2x3x256xf32>
    %cst_25 = arith.constant dense<0.000000e+00> : vector<2x256xf32>
    %74 = vector.multi_reduction <add>, %73, %cst_25 [1] : vector<2x3x256xf32> to vector<2x256xf32>
    %75 = vector.shape_cast %74 : vector<2x256xf32> to vector<2x1x256xf32>
    %cst_26 = arith.constant 0.333333343 : f32
    %76 = vector.broadcast %cst_26 : f32 to vector<2x1x256xf32>
    %77 = arith.mulf %75, %76 : vector<2x1x256xf32>
    %c0_27 = arith.constant 0 : index
    %c8 = arith.constant 8 : index
    %c0_28 = arith.constant 0 : index
    %78 = vector.load %arg2[%c0_27, %c8, %c0_28] : memref<2x16x256xf32, #tpu.memory_space<vmem>>, vector<2x4x256xf32>
    %79 = vector.broadcast %77 : vector<2x1x256xf32> to vector<2x4x256xf32>
    %80 = arith.mulf %78, %79 : vector<2x4x256xf32>
    %81 = arith.addf %80, %78 : vector<2x4x256xf32>
    %c0_29 = arith.constant 0 : index
    %c8_30 = arith.constant 8 : index
    %c0_31 = arith.constant 0 : index
    %82 = vector.load %arg4[%c0_29, %c8_30, %c0_31] : memref<2x16x256xf32, #tpu.memory_space<vmem>>, vector<2x4x256xf32>
    tpu.vector_store %arg4[%c0_29, %c8_30, %c0_31], %81 {strides = array<i32>} : memref<2x16x256xf32, #tpu.memory_space<vmem>>, vector<2x4x256xf32>,
    %83 = arith.subf %44, %49 : vector<2x3x256xf32>
    %84 = math.absf %83 : vector<2x3x256xf32>
    %cst_32 = arith.constant dense<0.000000e+00> : vector<2x256xf32>
    %85 = vector.multi_reduction <add>, %84, %cst_32 [1] : vector<2x3x256xf32> to vector<2x256xf32>
    %86 = vector.shape_cast %85 : vector<2x256xf32> to vector<2x1x256xf32>
    %cst_33 = arith.constant 0.333333343 : f32
    %87 = vector.broadcast %cst_33 : f32 to vector<2x1x256xf32>
    %88 = arith.mulf %86, %87 : vector<2x1x256xf32>
    %c0_34 = arith.constant 0 : index
    %c12 = arith.constant 12 : index
    %c0_35 = arith.constant 0 : index
    %89 = vector.load %arg2[%c0_34, %c12, %c0_35] : memref<2x16x256xf32, #tpu.memory_space<vmem>>, vector<2x4x256xf32>
    %90 = vector.broadcast %88 : vector<2x1x256xf32> to vector<2x4x256xf32>
    %91 = arith.mulf %89, %90 : vector<2x4x256xf32>
    %92 = arith.addf %91, %89 : vector<2x4x256xf32>
    %c0_36 = arith.constant 0 : index
    %c12_37 = arith.constant 12 : index
    %c0_38 = arith.constant 0 : index
    %93 = vector.load %arg4[%c0_36, %c12_37, %c0_38] : memref<2x16x256xf32, #tpu.memory_space<vmem>>, vector<2x4x256xf32>
    tpu.vector_store %arg4[%c0_36, %c12_37, %c0_38], %92 {strides = array<i32>} : memref<2x16x256xf32, #tpu.memory_space<vmem>>, vector<2x4x256xf32>,
    return
  }
  func.func @transform_0(%arg0: i32, %arg1: i32) -> (i32, i32, i32) {
    %c0_i32 = arith.constant 0 : i32
    %c0_i32_0 = arith.constant 0 : i32
    return %arg0, %c0_i32, %arg1 : i32, i32, i32
  }
  func.func @transform_1(%arg0: i32, %arg1: i32) -> (i32, i32, i32) {
    %c0_i32 = arith.constant 0 : i32
    %c0_i32_0 = arith.constant 0 : i32
    return %arg0, %c0_i32, %arg1 : i32, i32, i32
  }
  func.func @transform_2(%arg0: i32, %arg1: i32) -> (i32, i32, i32) {
    %c0_i32 = arith.constant 0 : i32
    %c0_i32_0 = arith.constant 0 : i32
    return %arg0, %c0_i32, %arg1 : i32, i32, i32
  }
}

</mosaic_0001>

<bundles_post_ra>
// kernel: tpu_custom_call.1
= control target key start
LH: loop header
LB: loop body
LE: loop exit
PB: predicated region body
PF: predicated region fallthrough
CT: control target
= control target key end

     0   :  { %vm20_vm0 = vcmask 1042432   ;;  %vm97_vm1 = vcmask 1045507   ;;  %vm186_vm2 = vcmask 1047558   ;;  %vm188_vm3 = vcmask 1040384   ;;  %s1298_s0 = inlined_call_operand.vmem [shape: f32[2,16,256], index: 0, kind: input, shape index: {}]   ;;  %s1299_s1 = inlined_call_operand.vmem [shape: f32[2,12,256], index: 1, kind: input, shape index: {}]   ;;  %s1300_s2 = inlined_call_operand.hbm [shape: f32[2,16,256], index: 2, kind: output, shape index: {}]  }
   0x1   :  { %v910_v0 = vld [vmem:[%s1299_s1] sm:$0xff]  ;;  %v915_v1 = vld [vmem:[%s1299_s1 + $0x10] sm:$0xf]  ;;  %v928_v8 = vld [vmem:[%s1299_s1 + $0x8] sm:$0xff]  ;;  %vm313_vm4 = vcmask 1043457  }
   0x2   :  { %v21_v2 = vsel %vm20_vm0, %v910_v0, -inf  ;;  %v98_v3 = vsel %vm97_vm1, %v910_v0, -inf  ;;  %v187_v4 = vsel %vm186_vm2, %v910_v0, -inf  ;;  %v189_v7 = vsel %vm188_vm3, %v915_v1, -inf  ;;  %v933_v10 = vld [vmem:[%s1299_s1 + $0x18] sm:$0xf] }
   0x3   :  { %v22_v5 = vrot.slane %v21_v2, 4  ;;  %v99_v6 = vrot.slane %v98_v3, 4  ;;  %v190_v9 = vmax.f32 %v187_v4, %v189_v7  ;;  %v28_v11 = vsel %vm20_vm0, %v928_v8, -inf }
   0x4   :  { %v105_v12 = vsel %vm97_vm1, %v928_v8, -inf  ;;  %v314_v15 = vsel %vm313_vm4, %v915_v1, -inf  ;;  %v29_v16 = vrot.slane %v28_v11, 4  ;;  %v197_v20 = vsel %vm186_vm2, %v928_v8, -inf }
   0x5   :  { %v23_v13 = vmax.f32 %v21_v2, %v22_v5  ;;  %v100_v14 = vmax.f32 %v98_v3, %v99_v6  ;;  %v191_v17 = vrot.slane %v190_v9, 4  ;;  %v315_v18 = vrot.slane %v314_v15, 4 }
   0x6   :  { %v106_v19 = vrot.slane %v105_v12, 4  ;;  %v30_v23 = vmax.f32 %v28_v11, %v29_v16  ;;  %v198_v24 = vsel %vm188_vm3, %v933_v10, -inf }
   0x7   :  { %v24_v21 = vrot.slane %v23_v13, 2  ;;  %v101_v22 = vrot.slane %v100_v14, 2  ;;  %v192_v25 = vmax.f32 %v190_v9, %v191_v17  ;;  %v316_v26 = vmax.f32 %v314_v15, %v315_v18 }
   0x8   :  { %v107_v27 = vmax.f32 %v105_v12, %v106_v19  ;;  %v199_v28 = vmax.f32 %v197_v20, %v198_v24 }
   0x9   :  { %7 = vsyncpa [#allocation3], 0  ;;  %v25_v29 = vmax.f32 %v23_v13, %v24_v21  ;;  %v102_v30 = vmax.f32 %v100_v14, %v101_v22  ;;  %v31_v31 = vrot.slane %v30_v23, 2  ;;  %v321_v32 = vsel %vm313_vm4, %v933_v10, -inf  ;;  %v957_v12 = vld [vmem:[%s1299_s1 + $0x20] sm:$0xff]  ;;  %s889_s27 = smov [#allocation2]  }
   0xa   :  { %v193_v33 = vrot.slane %v192_v25, 2  ;;  %v317_v34 = vrot.slane %v316_v26, 2  ;;  %v108_v35 = vrot.slane %v107_v27, 2  ;;  %v200_v36 = vrot.slane %v199_v28, 4  ;;  %s779_s28 = sshll.u32 %s889_s27, 4  ;;  %s780_s28 = int_to_ptr.vmem [resolvable:$true] %s779_s28 }
   0xb   :  { %v26_v37 = vrot.slane %v25_v29, 1  ;;  %v103_v38 = vrot.slane %v102_v30, 1  ;;  %v32_v39 = vmax.f32 %v30_v23, %v31_v31  ;;  %v322_v40 = vrot.slane %v321_v32, 4  ;;  %s865_s29 = scalar_lea.vmem %s780_s28, 1024  ;;  %p870_p1 = scmp.lt.s32.totalorder %s780_s28, %s780_s28 }
   0xc   :  { %v194_v41 = vmax.f32 %v192_v25, %v193_v33  ;;  %v318_v42 = vmax.f32 %v316_v26, %v317_v34  ;;  %v109_v43 = vmax.f32 %v107_v27, %v108_v35  ;;  %v201_v44 = vmax.f32 %v199_v28, %v200_v36  ;;  %p866_p0 = scmp.ne.s32.totalorder %s780_s28, %s865_s29  ;;  %p871_p2 = scmp.lt.s32.totalorder %s865_s29, %s865_s29 }
   0xd   :  { %v27_v45 = vmax.f32 %v25_v29, %v26_v37  ;;  %v104_v46 = vmax.f32 %v102_v30, %v103_v38  ;;  %v33_v47 = vrot.slane %v32_v39, 1  ;;  %v323_v48 = vmax.f32 %v321_v32, %v322_v40 }
   0xe   :  { %v195_v49 = vrot.slane %v194_v41, 1  ;;  %v319_v50 = vrot.slane %v318_v42, 1  ;;  %v110_v51 = vrot.slane %v109_v43, 1  ;;  %v202_v52 = vrot.slane %v201_v44, 2  ;;  %p872_p3 = por %p871_p2, %p870_p1 }
   0xf   :  { %v49_v53 = vsub.f32 %v910_v0, %v27_v45  ;;  %v126_v54 = vsub.f32 %v910_v0, %v104_v46  ;;  %v34_v55 = vmax.f32 %v32_v39, %v33_v47  ;;  %v324_v56 = vrot.slane %v323_v48, 2 }
  0x10   :  { %v196_v57 = vmax.f32 %v194_v41, %v195_v49  ;;  %v320_v58 = vmax.f32 %v318_v42, %v319_v50  ;;  %v111_v59 = vmax.f32 %v109_v43, %v110_v51  ;;  %v203_v60 = vmax.f32 %v201_v44, %v202_v52  ;;  %p873_p4 = pnand %p872_p3, %p866_p0 }
  0x11   :  { %v53_v61 = vmul.f32 1.442695, %v49_v53  ;;  %v130_v62 = vmul.f32 1.442695, %v126_v54  ;;  %v50_v63 = vsub.f32 %v928_v8, %v34_v55  ;;  %v325_v2 = vmax.f32 %v323_v48, %v324_v56 }
  0x12   :  { %v224_v3 = vsub.f32 %v910_v0, %v196_v57  ;;  %v226_v4 = vsub.f32 %v915_v1, %v196_v57  ;;  %v342_v5 = vsub.f32 %v915_v1, %v320_v58  ;;  %v127_v6 = vsub.f32 %v928_v8, %v111_v59  ;;  %v962_v1 = vld [vmem:[%s1299_s1 + $0x30] sm:$0xf] }
  0x13   :  { %793 = vpow2.f32 %v53_v61  ;;  %v55_v7 = vmul.f32 1.442695, %v50_v63  ;;  %v204_v9 = vrot.slane %v203_v60, 1  ;;  %v326_v11 = vrot.slane %v325_v2, 1 }
  0x14   :  { %795 = vpow2.f32 %v130_v62  ;;  %v232_v13 = vmul.f32 1.442695, %v224_v3  ;;  %v236_v14 = vmul.f32 1.442695, %v226_v4  ;;  %v346_v15 = vmul.f32 1.442695, %v342_v5 }
  0x15   :  { %797 = vpow2.f32 %v55_v7  ;;  %v132_v0 = vmul.f32 1.442695, %v127_v6  ;;  %v205_v16 = vmax.f32 %v203_v60, %v204_v9  ;;  %v327_v17 = vmax.f32 %v325_v2, %v326_v11 }
  0x16   :  { %799 = vpow2.f32 %v232_v13  ;;  %v35_v18 = vsel %vm20_vm0, %v957_v12, -inf  ;;  %v112_v19 = vsel %vm97_vm1, %v957_v12, -inf  ;;  %v206_v20 = vsel %vm186_vm2, %v957_v12, -inf }
  0x17   :  { %801 = vpow2.f32 %v236_v14  ;;  %v225_v21 = vsub.f32 %v928_v8, %v205_v16  ;;  %v227_v22 = vsub.f32 %v933_v10, %v205_v16  ;;  %v343_v23 = vsub.f32 %v933_v10, %v327_v17  ;;  %v980_v10 = vld [vmem:[%s1299_s1 + $0x28] sm:$0xff] }
  0x18   :  { %803 = vpow2.f32 %v346_v15  ;;  %v36_v24 = vrot.slane %v35_v18, 4  ;;  %v113_v25 = vrot.slane %v112_v19, 4  ;;  %v207_v26 = vsel %vm188_vm3, %v962_v1, -inf }
  0x19   :  { %vm256_vm5 = vcmask 1041408   ;;  %805 = vpow2.f32 %v132_v0  ;;  %v234_v27 = vmul.f32 1.442695, %v225_v21  ;;  %v238_v28 = vmul.f32 1.442695, %v227_v22 }
  0x1a   :  { %v348_v29 = vmul.f32 1.442695, %v343_v23  ;;  %v37_v30 = vmax.f32 %v35_v18, %v36_v24  ;;  %v114_v31 = vmax.f32 %v112_v19, %v113_v25  ;;  %v208_v32 = vmax.f32 %v206_v20, %v207_v26 }
  0x1b   :  { %v328_v8 = vsel %vm313_vm4, %v962_v1, -inf  ;;  %807 = vpow2.f32 %v234_v27  ;;  %v42_v34 = vsel %vm20_vm0, %v980_v10, -inf  ;;  %v986_v35 = vsel %vm97_vm1, %v980_v10, -inf }
  0x1c   :  { %v329_v33 = vrot.slane %v328_v8, 4  ;;  %809 = vpow2.f32 %v238_v28  ;;  %v38_v36 = vrot.slane %v37_v30, 2  ;;  %v115_v37 = vrot.slane %v114_v31, 2 }
  0x1d   :  { %v209_v38 = vrot.slane %v208_v32, 4  ;;  %v988_v39 = vpop.eup %793  ;;  %811 = vpow2.f32 %v348_v29  ;;  %v43_v41 = vrot.slane %v42_v34, 4  ;;  %v120_v42 = vrot.slane %v986_v35, 4 }
  0x1e   :  { %v990_v40 = vmax.f32 %v328_v8, %v329_v33  ;;  %v993_v43 = vpop.eup %795  ;;  %v61_v44 = vsel %vm20_vm0, %v988_v39, 0.0  ;;  %v39_v45 = vmax.f32 %v37_v30, %v38_v36  ;;  %v116_v46 = vmax.f32 %v114_v31, %v115_v37 }
  0x1f   :  { %v210_v47 = vmax.f32 %v208_v32, %v209_v38  ;;  %v997_v48 = vpop.eup %797  ;;  %v62_v49 = vrot.slane %v61_v44, 4  ;;  %v142_v50 = vrot.slane %v993_v43, 3  ;;  %v1001_v52 = vmax.f32 %v42_v34, %v43_v41 }
  0x20   :  { %v331_v51 = vrot.slane %v990_v40, 2  ;;  %v1003_v53 = vpop.eup %799  ;;  %v68_v54 = vsel %vm20_vm0, %v997_v48, 0.0  ;;  %v40_v55 = vrot.slane %v39_v45, 1  ;;  %v117_v56 = vrot.slane %v116_v46, 1 }
  0x21   :  { %v211_v57 = vrot.slane %v210_v47, 2  ;;  %v1007_v58 = vpop.eup %801  ;;  %v63_v59 = vadd.f32 %v62_v49, %v61_v44  ;;  %v150_v60 = vsel %vm20_vm0, %v142_v50, 0.0  ;;  %v257_v61 = vrot.slane %v1003_v53, 6 }
  0x22   :  { %v69_v62 = vrot.slane %v68_v54, 4  ;;  %v1011_v63 = vpop.eup %803  ;;  %v151_v2 = vrot.slane %v150_v60, 4  ;;  %v258_v3 = vrot.slane %v1007_v58, 6  ;;  %v41_v4 = vmax.f32 %v39_v45, %v40_v55 }
  0x23   :  { %v1014_v5 = vmax.f32 %v116_v46, %v117_v56  ;;  %v1016_v6 = vpop.eup %805  ;;  %v64_v7 = vrot.slane %v63_v59, 2  ;;  %v358_v9 = vrot.slane %v1011_v63, 1  ;;  %v212_v13 = vmax.f32 %v210_v47, %v211_v57 }
  0x24   :  { %v70_v11 = vadd.f32 %v69_v62, %v68_v54  ;;  %v152_v14 = vadd.f32 %v151_v2, %v150_v60  ;;  %v259_v15 = vsel %vm256_vm5, %v257_v61, %v258_v3  ;;  %v143_v0 = vrot.slane %v1016_v6, 3 }
  0x25   :  { %v51_v16 = vsub.f32 %v957_v12, %v41_v4  ;;  %v1022_v17 = vpop.eup %807  ;;  %v65_v18 = vadd.f32 %v64_v7, %v63_v59  ;;  %v273_v19 = vsel %vm20_vm0, %v259_v15, 0.0  ;;  %v366_v20 = vsel %vm20_vm0, %v358_v9, 0.0 }
  0x26   :  { %v71_v21 = vrot.slane %v70_v11, 2  ;;  %v1026_v22 = vpop.eup %809  ;;  %v153_v23 = vrot.slane %v152_v14, 2  ;;  %v274_v24 = vrot.slane %v273_v19, 4  ;;  %v367_v25 = vrot.slane %v366_v20, 4 }
  0x27   :  { %v157_v26 = vsel %vm20_vm0, %v143_v0, 0.0  ;;  %v1029_v27 = vpop.eup %811  ;;  %v66_v28 = vrot.slane %v65_v18, 1  ;;  %v260_v31 = vrot.slane %v1022_v17, 6  ;;  %v261_v34 = vrot.slane %v1026_v22, 6 }
  0x28   :  { %v72_v29 = vadd.f32 %v71_v21, %v70_v11  ;;  %v158_v30 = vrot.slane %v157_v26, 4  ;;  %v154_v32 = vadd.f32 %v153_v23, %v152_v14  ;;  %v275_v8 = vadd.f32 %v274_v24, %v273_v19 }
  0x29   :  { %v368_v33 = vadd.f32 %v367_v25, %v366_v20  ;;  %v67_v36 = vadd.f32 %v66_v28, %v65_v18  ;;  %v359_v41 = vrot.slane %v1029_v27, 1  ;;  %v262_v47 = vsel %vm256_vm5, %v260_v31, %v261_v34 }
  0x2a   :  { %v73_v37 = vrot.slane %v72_v29, 1  ;;  %v159_v38 = vadd.f32 %v158_v30, %v157_v26  ;;  %v155_v44 = vrot.slane %v154_v32, 1  ;;  %v276_v45 = vrot.slane %v275_v8, 2 }
  0x2b   :  { %v369_v46 = vrot.slane %v368_v33, 2  ;;  %813 = vrcp.f32 %v67_v36  ;;  %v280_v54 = vsel %vm20_vm0, %v262_v47, 0.0  ;;  %v373_v61 = vsel %vm20_vm0, %v359_v41, 0.0 }
  0x2c   :  { %v74_v49 = vadd.f32 %v73_v37, %v72_v29  ;;  %v160_v50 = vrot.slane %v159_v38, 2  ;;  %v156_v55 = vadd.f32 %v155_v44, %v154_v32  ;;  %v277_v56 = vadd.f32 %v276_v45, %v275_v8 }
  0x2d   :  { %v370_v57 = vadd.f32 %v369_v46, %v368_v33  ;;  %v281_v59 = vrot.slane %v280_v54, 4  ;;  %v57_v62 = vmul.f32 1.442695, %v51_v16  ;;  %v374_v9 = vrot.slane %v373_v61, 4 }
  0x2e   :  { %815 = vrcp.f32 %v74_v49  ;;  %v161_v60 = vadd.f32 %v160_v50, %v159_v38  ;;  %v278_v2 = vrot.slane %v277_v56, 1  ;;  %v128_v11 = vsub.f32 %v957_v12, %v1014_v5 }
  0x2f   :  { %817 = vrcp.f32 %v156_v55  ;;  %v371_v3 = vrot.slane %v370_v57, 1  ;;  %v282_v4 = vadd.f32 %v281_v59, %v280_v54  ;;  %v213_v18 = vrot.slane %v212_v13, 1 }
  0x30   :  { %v162_v7 = vrot.slane %v161_v60, 1  ;;  %819 = vpow2.f32 %v57_v62  ;;  %v279_v14 = vadd.f32 %v278_v2, %v277_v56  ;;  %v375_v20 = vadd.f32 %v374_v9, %v373_v61 }
  0x31   :  { %v372_v15 = vadd.f32 %v371_v3, %v370_v57  ;;  %v283_v0 = vrot.slane %v282_v4, 2  ;;  %v134_v21 = vmul.f32 1.442695, %v128_v11  ;;  %v332_v16 = vmax.f32 %v990_v40, %v331_v51 }
  0x32   :  { %v163_v19 = vadd.f32 %v162_v7, %v161_v60  ;;  %821 = vrcp.f32 %v279_v14  ;;  %v214_v24 = vmax.f32 %v212_v13, %v213_v18  ;;  %v45_v25 = vrot.slane %v1001_v52, 2  ;;  %v1051_v13 = vld [vmem:[%s1299_s1 + $0x38] sm:$0xf] }
  0x33   :  { %v284_v23 = vadd.f32 %v283_v0, %v282_v4  ;;  %823 = vrcp.f32 %v372_v15  ;;  %v376_v26 = vrot.slane %v375_v20, 2  ;;  %v333_v28 = vrot.slane %v332_v16, 1 }
  0x34   :  { %v121_v5 = vmax.f32 %v986_v35, %v120_v42  ;;  %825 = vrcp.f32 %v163_v19  ;;  %v228_v30 = vsub.f32 %v957_v12, %v214_v24  ;;  %v230_v31 = vsub.f32 %v962_v1, %v214_v24 }
  0x35   :  { %v285_v29 = vrot.slane %v284_v23, 1  ;;  %v814_v32 = vpop.eup %813  ;;  %v377_v40 = vadd.f32 %v376_v26, %v375_v20  ;;  %827 = vpow2.f32 %v134_v21  ;;  %v334_v51 = vmax.f32 %v332_v16, %v333_v28 }
  0x36   :  { %v46_v8 = vmax.f32 %v1001_v52, %v45_v25  ;;  %v1055_v33 = vmul.f32 %v814_v32, %v988_v39  ;;  %v240_v42 = vmul.f32 1.442695, %v228_v30  ;;  %v244_v34 = vmul.f32 1.442695, %v230_v31 }
  0x37   :  { %v286_v35 = vadd.f32 %v285_v29, %v284_v23  ;;  %v378_v36 = vrot.slane %v377_v40, 1  ;;  %v344_v37 = vsub.f32 %v962_v1, %v334_v51  ;;  %v122_v41 = vrot.slane %v121_v5, 2 }
  0x38   :  { %v816_v12 = vpop.eup %815  ;;  %v47_v38 = vrot.slane %v46_v8, 1  ;;  %v215_v52 = vsel %vm186_vm2, %v980_v10, -inf  ;;  %v216_v39 = vsel %vm188_vm3, %v1051_v13, -inf  ;;  %v335_v61 = vsel %vm313_vm4, %v1051_v13, -inf }
  0x39   :  { %v818_v44 = vpop.eup %817  ;;  %v1059_v45 = vmul.f32 %v816_v12, %v997_v48  ;;  %829 = vrcp.f32 %v286_v35  ;;  %v379_v49 = vadd.f32 %v378_v36, %v377_v40  ;;  %v350_v1 = vmul.f32 1.442695, %v344_v37 }
  0x3a   :  { %v1065_v46 = vpop.eup %819  ;;  %v1068_v47 = vmul.f32 %v818_v44, %v993_v43  ;;  %831 = vpow2.f32 %v240_v42  ;;  %v48_v48 = vmax.f32 %v46_v8, %v47_v38  ;;  %v123_v54 = vmax.f32 %v121_v5, %v122_v41 }
  0x3b   :  { %v75_v50 = vsel %vm20_vm0, %v1065_v46, 0.0  ;;  %833 = vpow2.f32 %v244_v34  ;;  %v217_v57 = vmax.f32 %v215_v52, %v216_v39  ;;  %v336_v30 = vrot.slane %v335_v61, 4 }
  0x3c   :  { %v406_v55 = vrot.slane %v1068_v47, 3  ;;  %835 = vrcp.f32 %v379_v49  ;;  %v76_v56 = vrot.slane %v75_v50, 4  ;;  %v822_v59 = vpop.eup %821  ;;  %v52_v60 = vsub.f32 %v980_v10, %v48_v48 }
  0x3d   :  { %837 = vpow2.f32 %v350_v1  ;;  %v124_v43 = vrot.slane %v123_v54, 1  ;;  %v824_v62 = vpop.eup %823  ;;  %v1077_v2 = vmul.f32 %v822_v59, %v1003_v53  ;;  %v1080_v3 = vmul.f32 %v822_v59, %v1007_v58 }
  0x3e   :  { %v414_v4 = vadd.f32 %v406_v55, %v1055_v33  ;;  %v77_v7 = vadd.f32 %v76_v56, %v75_v50  ;;  %v826_v9 = vpop.eup %825  ;;  %v1084_v11 = vmul.f32 %v824_v62, %v1011_v63  ;;  %v59_v14 = vmul.f32 1.442695, %v52_v60 }
  0x3f   :  { %v125_v15 = vmax.f32 %v123_v54, %v124_v43  ;;  %v218_v0 = vrot.slane %v217_v57, 4  ;;  %v1086_v18 = vpop.eup %827  ;;  %v426_v19 = vrot.slane %v1077_v2, 6  ;;  %v427_v53 = vrot.slane %v1080_v3, 6 }
  0x40   :  { %v1091_v20 = vmul.f32 %v826_v9, %v1016_v6  ;;  %v78_v58 = vrot.slane %v77_v7, 2  ;;  %v450_v21 = vrot.slane %v1084_v11, 1  ;;  %v144_v16 = vrot.slane %v1086_v18, 3 }
  0x41   :  { %839 = vpow2.f32 %v59_v14  ;;  %v129_v63 = vsub.f32 %v980_v10, %v125_v15  ;;  %v428_v23 = vsel %vm256_vm5, %v426_v19, %v427_v53  ;;  %v219_v26 = vmax.f32 %v217_v57, %v218_v0 }
  0x42   :  { %v407_v24 = vrot.slane %v1091_v20, 3  ;;  %v79_v25 = vadd.f32 %v78_v58, %v77_v7  ;;  %v442_v5 = vadd.f32 %v428_v23, %v414_v4  ;;  %v164_v29 = vsel %vm20_vm0, %v144_v16, 0.0 }
  0x43   :  { %v830_v28 = vpop.eup %829  ;;  %v136_v6 = vmul.f32 1.442695, %v129_v63  ;;  %v165_v34 = vrot.slane %v164_v29, 4  ;;  %v220_v49 = vrot.slane %v219_v26, 2  ;;  %v337_v43 = vmax.f32 %v335_v61, %v336_v30 }
  0x44   :  { %v1099_v31 = vpop.eup %831  ;;  %v1102_v32 = vmul.f32 %v830_v28, %v1022_v17  ;;  %v1105_v40 = vmul.f32 %v830_v28, %v1026_v22  ;;  %v415_v51 = vadd.f32 %v407_v24, %v1059_v45  ;;  %v80_v8 = vrot.slane %v79_v25, 1 }
  0x45   :  { %v1108_v35 = vpop.eup %833  ;;  %v458_v42 = vadd.f32 %v450_v21, %v442_v5  ;;  %v263_v12 = vrot.slane %v1099_v31, 6  ;;  %841 = vpow2.f32 %v136_v6  ;;  %v166_v39 = vadd.f32 %v165_v34, %v164_v29 }
  0x46   :  { %v836_v36 = vpop.eup %835  ;;  %v429_v37 = vrot.slane %v1102_v32, 6  ;;  %v430_v38 = vrot.slane %v1105_v40, 6  ;;  %v81_v17 = vadd.f32 %v80_v8, %v79_v25  ;;  %v264_v41 = vrot.slane %v1108_v35, 6 }
  0x47   :  { %v1114_v22 = vpop.eup %837  ;;  %v1116_v44 = vmul.f32 0.25, %v458_v42  ;;  %v1119_v52 = vmul.f32 %v836_v36, %v1029_v27  ;;  %v167_v57 = vrot.slane %v166_v39, 2  ;;  %v221_v60 = vmax.f32 %v219_v26, %v220_v49 }
  0x48   :  { %v431_v1 = vsel %vm256_vm5, %v429_v37, %v430_v38  ;;  %843 = vrcp.f32 %v81_v17  ;;  %v265_v50 = vsel %vm256_vm5, %v263_v12, %v264_v41  ;;  %v360_v48 = vrot.slane %v1114_v22, 1 }
  0x49   :  { %v466_v54 = vsub.f32 %v1055_v33, %v1116_v44  ;;  %v443_v55 = vadd.f32 %v431_v1, %v415_v51  ;;  %v451_v56 = vrot.slane %v1119_v52, 1  ;;  %v287_v59 = vsel %vm20_vm0, %v265_v50, 0.0 }
  0x4a   :  { %v380_v27 = vsel %vm20_vm0, %v360_v48, 0.0  ;;  %v168_v9 = vadd.f32 %v167_v57, %v166_v39  ;;  %v288_v14 = vrot.slane %v287_v59, 4  ;;  %v222_v0 = vrot.slane %v221_v60, 1 }
  0x4b   :  { %v1129_v62 = vpop.eup %839  ;;  %v470_v4 = vand.u32 2147483647, %v466_v54  ;;  %v459_v7 = vadd.f32 %v451_v56, %v443_v55  ;;  %v381_v15 = vrot.slane %v380_v27, 4  ;;  %v338_v19 = vrot.slane %v337_v43, 2 }
  0x4c   :  { %v82_v33 = vsel %vm20_vm0, %v1129_v62, 0.0  ;;  %v169_v21 = vrot.slane %v168_v9, 1  ;;  %v289_v16 = vadd.f32 %v288_v14, %v287_v59  ;;  %v223_v24 = vmax.f32 %v221_v60, %v222_v0  ;;  %v506_v0 = vld [vmem:[%s1298_s0] sm:$0xf] }
  0x4d   :  { %v474_v53 = vsel %vm20_vm0, %v470_v4, 0.0  ;;  %v1134_v58 = vmul.f32 0.25, %v459_v7  ;;  %v382_v61 = vadd.f32 %v381_v15, %v380_v27  ;;  %v83_v23 = vrot.slane %v82_v33, 4 }
  0x4e   :  { %v475_v63 = vrot.slane %v474_v53, 4  ;;  %v170_v28 = vadd.f32 %v169_v21, %v168_v9  ;;  %v290_v5 = vrot.slane %v289_v16, 2  ;;  %v339_v29 = vmax.f32 %v337_v43, %v338_v19 }
  0x4f   :  { %v1136_v25 = vpop.eup %841  ;;  %v467_v26 = vsub.f32 %v1059_v45, %v1134_v58  ;;  %v383_v30 = vrot.slane %v382_v61, 2  ;;  %v84_v51 = vadd.f32 %v83_v23, %v82_v33  ;;  %v229_v12 = vsub.f32 %v980_v10, %v223_v24 }
  0x50   :  { %v476_v6 = vadd.f32 %v475_v63, %v474_v53  ;;  %v145_v8 = vrot.slane %v1136_v25, 3  ;;  %845 = vrcp.f32 %v170_v28  ;;  %v291_v34 = vadd.f32 %v290_v5, %v289_v16 }
  0x51   :  { %v471_v42 = vand.u32 2147483647, %v467_v26  ;;  %v384_v38 = vadd.f32 %v383_v30, %v382_v61  ;;  %v85_v17 = vrot.slane %v84_v51, 2  ;;  %v231_v10 = vsub.f32 %v1051_v13, %v223_v24 }
  0x52   :  { %v844_v36 = vpop.eup %843  ;;  %v477_v37 = vrot.slane %v476_v6, 2  ;;  %v171_v41 = vsel %vm20_vm0, %v145_v8, 0.0  ;;  %v292_v49 = vrot.slane %v291_v34, 1  ;;  %v242_v59 = vmul.f32 1.442695, %v229_v12 }
  0x53   :  { %v481_v45 = vsel %vm20_vm0, %v471_v42, 0.0  ;;  %v1145_v39 = vmul.f32 %v844_v36, %v1065_v46  ;;  %v172_v1 = vrot.slane %v171_v41, 4  ;;  %v385_v54 = vrot.slane %v384_v38, 1 }
  0x54   :  { %v478_v50 = vadd.f32 %v477_v37, %v476_v6  ;;  %v482_v48 = vrot.slane %v481_v45, 4  ;;  %v86_v55 = vadd.f32 %v85_v17, %v84_v51  ;;  %v293_v56 = vadd.f32 %v292_v49, %v291_v34 }
  0x55   :  { %v173_v57 = vadd.f32 %v172_v1, %v171_v41  ;;  %v386_v43 = vadd.f32 %v385_v54, %v384_v38  ;;  %v246_v9 = vmul.f32 1.442695, %v231_v10  ;;  %v340_v46 = vrot.slane %v339_v29, 1 }
  0x56   :  { %v479_v27 = vrot.slane %v478_v50, 1  ;;  %v483_v60 = vadd.f32 %v482_v48, %v481_v45  ;;  %v87_v4 = vrot.slane %v86_v55, 1  ;;  %847 = vrcp.f32 %v293_v56 }
  0x57   :  { %v174_v7 = vrot.slane %v173_v57, 2  ;;  %849 = vrcp.f32 %v386_v43  ;;  %v341_v53 = vmax.f32 %v339_v29, %v340_v46  ;;  %v526_v21 = vrot.slane %v1116_v44, 5 }
  0x58   :  { %v480_v14 = vadd.f32 %v479_v27, %v478_v50  ;;  %v484_v15 = vrot.slane %v483_v60, 2  ;;  %v88_v33 = vadd.f32 %v87_v4, %v86_v55  ;;  %851 = vpow2.f32 %v242_v59 }
  0x59   :  { %v175_v19 = vadd.f32 %v174_v7, %v173_v57  ;;  %v527_v61 = vrot.slane %v1134_v58, 5  ;;  %v345_v26 = vsub.f32 %v1051_v13, %v341_v53  ;;  %v534_v28 = vsub.f32 %v1068_v47, %v526_v21  ;;  %v507_v13 = vld [vmem:[%s1298_s0 + $0x8] sm:$0xf] }
  0x5a   :  { %v502_v16 = vmul.f32 0.33333334, %v480_v14  ;;  %v485_v63 = vadd.f32 %v484_v15, %v483_v60  ;;  %853 = vrcp.f32 %v88_v33  ;;  %v846_v23 = vpop.eup %845  ;;  %v602_v34 = vrot.slane %v1116_v44, 2 }
  0x5b   :  { %v176_v24 = vrot.slane %v175_v19, 1  ;;  %855 = vpow2.f32 %v246_v9  ;;  %v1156_v30 = vmul.f32 %v846_v23, %v1086_v18  ;;  %v535_v29 = vsub.f32 %v1091_v20, %v527_v61 }
  0x5c   :  { %v510_v5 = vmul.f32 %v506_v0, %v502_v16  ;;  %v486_v6 = vrot.slane %v485_v63, 1  ;;  %v352_v8 = vmul.f32 1.442695, %v345_v26  ;;  %v538_v42 = vand.u32 2147483647, %v534_v28 }
  0x5d   :  { %v177_v51 = vadd.f32 %v176_v24, %v175_v19  ;;  %v408_v37 = vrot.slane %v1156_v30, 3  ;;  %v539_v38 = vand.u32 2147483647, %v535_v29  ;;  %v610_v18 = vsub.f32 %v1077_v2, %v602_v34 }
  0x5e   :  { %v514_v12 = vadd.f32 %v510_v5, %v506_v0  ;;  %v487_v36 = vadd.f32 %v486_v6, %v485_v63  ;;  %v546_v47 = vrot.slane %v538_v42, 3  ;;  %v612_v20 = vsub.f32 %v1080_v3, %v602_v34 }
  0x5f   :  { %857 = vrcp.f32 %v177_v51  ;;  %v416_v41 = vadd.f32 %v408_v37, %v1145_v39  ;;  %v547_v45 = vrot.slane %v539_v38, 3  ;;  %v618_v50 = vand.u32 2147483647, %v610_v18 }
  0x60   :  { %518 = vst [vmem:[#allocation2] sm:$0xf] %v514_v12  ;;  %v503_v17 = vmul.f32 0.33333334, %v487_v36  ;;  %859 = vpow2.f32 %v352_v8  ;;  %v848_v49 = vpop.eup %847  ;;  %v554_v1 = vsel %vm20_vm0, %v546_v47, 0.0  ;;  %v603_v54 = vrot.slane %v1134_v58, 2 }
  0x61   :  { %v620_v48 = vand.u32 2147483647, %v612_v20  ;;  %v850_v55 = vpop.eup %849  ;;  %v1170_v57 = vmul.f32 %v848_v49, %v1099_v31  ;;  %v1173_v2 = vmul.f32 %v848_v49, %v1108_v35  ;;  %v555_v3 = vrot.slane %v554_v1, 4 }
  0x62   :  { %v511_v56 = vmul.f32 %v507_v13, %v503_v17  ;;  %v1175_v10 = vpop.eup %851  ;;  %v1178_v59 = vmul.f32 %v850_v55, %v1114_v22  ;;  %v561_v27 = vsel %vm20_vm0, %v547_v45, 0.0  ;;  %v634_v60 = vrot.slane %v618_v50, 6  ;;  %v586_v50 = vld [vmem:[%s1298_s0] sm:$0xf0] }
  0x63   :  { %v635_v43 = vrot.slane %v620_v48, 6  ;;  %v432_v9 = vrot.slane %v1170_v57, 6  ;;  %v433_v31 = vrot.slane %v1173_v2, 6  ;;  %v266_v46 = vrot.slane %v1175_v10, 6 }
  0x64   :  { %v854_v4 = vpop.eup %853  ;;  %v515_v7 = vadd.f32 %v511_v56, %v507_v13  ;;  %v452_v14 = vrot.slane %v1178_v59, 1  ;;  %v556_v15 = vadd.f32 %v555_v3, %v554_v1  ;;  %v562_v33 = vrot.slane %v561_v27, 4 }
  0x65   :  { %v1184_v35 = vpop.eup %855  ;;  %v434_v22 = vsel %vm256_vm5, %v432_v9, %v433_v31  ;;  %v636_v19 = vsel %vm256_vm5, %v634_v60, %v635_v43  ;;  %v611_v53 = vsub.f32 %v1102_v32, %v603_v54  ;;  %v1193_v23 = vmul.f32 %v854_v4, %v1129_v62 }
  0x66   :  { %519 = vst [vmem:[#allocation2 + $0x8] sm:$0xf] %v515_v7  ;;  %v267_v0 = vrot.slane %v1184_v35, 6  ;;  %v444_v21 = vadd.f32 %v434_v22, %v416_v41  ;;  %v557_v16 = vrot.slane %v556_v15, 2  ;;  %v563_v63 = vadd.f32 %v562_v33, %v561_v27 }
  0x67   :  { %v650_v61 = vsel %vm20_vm0, %v636_v19, 0.0  ;;  %v613_v28 = vsub.f32 %v1105_v40, %v603_v54  ;;  %v619_v62 = vand.u32 2147483647, %v611_v53 }
  0x68   :  { %v268_v24 = vsel %vm256_vm5, %v266_v46, %v267_v0  ;;  %v651_v26 = vrot.slane %v650_v61, 4  ;;  %v460_v6 = vadd.f32 %v452_v14, %v444_v21  ;;  %v558_v51 = vadd.f32 %v557_v16, %v556_v15 }
  0x69   :  { %v858_v5 = vpop.eup %857  ;;  %v294_v29 = vsel %vm20_vm0, %v268_v24, 0.0  ;;  %v564_v8 = vrot.slane %v563_v63, 2  ;;  %v621_v20 = vand.u32 2147483647, %v613_v28  ;;  %v637_v54 = vrot.slane %v619_v62, 6 }
  0x6a   :  { %v1198_v32 = vpop.eup %859  ;;  %v1201_v42 = vmul.f32 %v858_v5, %v1136_v25  ;;  %v295_v34 = vrot.slane %v294_v29, 4  ;;  %v652_v12 = vadd.f32 %v651_v26, %v650_v61  ;;  %v1203_v36 = vmul.f32 0.25, %v460_v6 }
  0x6b   :  { %v361_v37 = vrot.slane %v1198_v32, 1  ;;  %v559_v38 = vrot.slane %v558_v51, 1  ;;  %v565_v40 = vadd.f32 %v564_v8, %v563_v63  ;;  %v638_v7 = vrot.slane %v621_v20, 6 }
  0x6c   :  { %v296_v13 = vadd.f32 %v295_v34, %v294_v29  ;;  %v409_v47 = vrot.slane %v1201_v42, 3  ;;  %v653_v18 = vrot.slane %v652_v12, 2  ;;  %v468_v17 = vsub.f32 %v1145_v39, %v1203_v36  ;;  %v587_v39 = vld [vmem:[%s1298_s0 + $0x8] sm:$0xf0] }
  0x6d   :  { %v387_v25 = vsel %vm20_vm0, %v361_v37, 0.0  ;;  %v560_v41 = vadd.f32 %v559_v38, %v558_v51  ;;  %v566_v45 = vrot.slane %v565_v40, 1  ;;  %v528_v48 = vrot.slane %v1203_v36, 5 }
  0x6e   :  { %v297_v49 = vrot.slane %v296_v13, 2  ;;  %v388_v1 = vrot.slane %v387_v25, 4  ;;  %v472_v55 = vand.u32 2147483647, %v468_v17  ;;  %v654_v27 = vadd.f32 %v653_v18, %v652_v12 }
  0x6f   :  { %v582_v56 = vmul.f32 0.33333334, %v560_v41  ;;  %v567_v3 = vadd.f32 %v566_v45, %v565_v40  ;;  %v536_v4 = vsub.f32 %v1156_v30, %v528_v48  ;;  %v639_v16 = vsel %vm256_vm5, %v637_v54, %v638_v7  ;;  %v682_v30 = vld [vmem:[%s1298_s0 + $0x10] sm:$0xf] }
  0x70   :  { %v298_v60 = vadd.f32 %v297_v49, %v296_v13  ;;  %v389_v43 = vadd.f32 %v388_v1, %v387_v25  ;;  %v488_v9 = vsel %vm20_vm0, %v472_v55, 0.0  ;;  %v655_v14 = vrot.slane %v654_v27, 1 }
  0x71   :  { %v590_v31 = vmul.f32 %v586_v50, %v582_v56  ;;  %v583_v46 = vmul.f32 0.33333334, %v567_v3  ;;  %v489_v15 = vrot.slane %v488_v9, 4  ;;  %v540_v0 = vand.u32 2147483647, %v536_v4 }
  0x72   :  { %v299_v33 = vrot.slane %v298_v60, 1  ;;  %v390_v22 = vrot.slane %v389_v43, 2  ;;  %v656_v21 = vadd.f32 %v655_v14, %v654_v27  ;;  %v657_v6 = vsel %vm20_vm0, %v639_v16, 0.0  ;;  %v508_v27 = vld [vmem:[%s1298_s0 + $0x20] sm:$0xf] }
  0x73   :  { %v594_v19 = vadd.f32 %v590_v31, %v586_v50  ;;  %v591_v53 = vmul.f32 %v587_v39, %v583_v46  ;;  %v490_v63 = vadd.f32 %v489_v15, %v488_v9  ;;  %v548_v26 = vrot.slane %v540_v0, 3 }
  0x74   :  { %v300_v61 = vadd.f32 %v299_v33, %v298_v60  ;;  %v391_v24 = vadd.f32 %v390_v22, %v389_v43  ;;  %v678_v5 = vmul.f32 0.33333334, %v656_v21  ;;  %v604_v29 = vrot.slane %v1203_v36, 2 }
  0x75   :  { %598 = vst [vmem:[#allocation2] sm:$0xf0] %v594_v19  ;;  %v595_v28 = vadd.f32 %v591_v53, %v587_v39  ;;  %v491_v51 = vrot.slane %v490_v63, 2  ;;  %v568_v34 = vsel %vm20_vm0, %v548_v26, 0.0  ;;  %v658_v37 = vrot.slane %v657_v6, 4 }
  0x76   :  { %861 = vrcp.f32 %v300_v61  ;;  %v392_v8 = vrot.slane %v391_v24, 1  ;;  %v569_v12 = vrot.slane %v568_v34, 4  ;;  %v686_v62 = vmul.f32 %v682_v30, %v678_v5 }
  0x77   :  { %599 = vst [vmem:[#allocation2 + $0x8] sm:$0xf0] %v595_v28  ;;  %v614_v38 = vsub.f32 %v1170_v57, %v604_v29  ;;  %v492_v40 = vadd.f32 %v491_v51, %v490_v63  ;;  %v616_v18 = vsub.f32 %v1173_v2, %v604_v29  ;;  %v698_v20 = vrot.slane %v1116_v44, 7  ;;  %v683_v63 = vld [vmem:[%s1298_s0 + $0x18] sm:$0xf] }
  0x78   :  { %v393_v13 = vadd.f32 %v392_v8, %v391_v24  ;;  %v570_v17 = vadd.f32 %v569_v12, %v568_v34  ;;  %v690_v25 = vadd.f32 %v686_v62, %v682_v30  ;;  %v659_v41 = vadd.f32 %v658_v37, %v657_v6 }
  0x79   :  { %v622_v45 = vand.u32 2147483647, %v614_v38  ;;  %v493_v49 = vrot.slane %v492_v40, 1  ;;  %v624_v1 = vand.u32 2147483647, %v616_v18  ;;  %v706_v50 = vsub.f32 %v1084_v11, %v698_v20 }
  0x7a   :  { %863 = vrcp.f32 %v393_v13  ;;  %v571_v48 = vrot.slane %v570_v17, 2  ;;  %694 = vst [vmem:[#allocation2 + $0x10] sm:$0xf] %v690_v25  ;;  %v660_v54 = vrot.slane %v659_v41, 2  ;;  %v699_v57 = vrot.slane %v1134_v58, 7 }
  0x7b   :  { %v640_v55 = vrot.slane %v622_v45, 6  ;;  %v494_v56 = vadd.f32 %v493_v49, %v492_v40  ;;  %v641_v3 = vrot.slane %v624_v1, 6  ;;  %v710_v2 = vand.u32 2147483647, %v706_v50 }
  0x7c   :  { %v700_v44 = vrot.slane %v1203_v36, 7  ;;  %v417_v60 = vadd.f32 %v409_v47, %v1193_v23  ;;  %v572_v11 = vadd.f32 %v571_v48, %v570_v17  ;;  %v661_v43 = vadd.f32 %v660_v54, %v659_v41 }
  0x7d   :  { %v707_v39 = vsub.f32 %v1119_v52, %v699_v57  ;;  %v504_v4 = vmul.f32 0.33333334, %v494_v56  ;;  %v642_v58 = vsel %vm256_vm5, %v640_v55, %v641_v3  ;;  %v718_v7 = vrot.slane %v710_v2, 1  ;;  %v684_v3 = vld [vmem:[%s1298_s0 + $0x30] sm:$0xf] }
  0x7e   :  { %v708_v9 = vsub.f32 %v1178_v59, %v700_v44  ;;  %v573_v31 = vrot.slane %v572_v11, 1  ;;  %v662_v36 = vrot.slane %v661_v43, 1  ;;  %v664_v46 = vsel %vm20_vm0, %v642_v58, 0.0  ;;  %v588_v59 = vld [vmem:[%s1298_s0 + $0x20] sm:$0xf0] }
  0x7f   :  { %v711_v14 = vand.u32 2147483647, %v707_v39  ;;  %v512_v33 = vmul.f32 %v508_v27, %v504_v4  ;;  %v665_v22 = vrot.slane %v664_v46, 4  ;;  %v726_v47 = vsel %vm20_vm0, %v718_v7, 0.0  ;;  %v758_v4 = vld [vmem:[%s1298_s0 + $0x10] sm:$0xf0] }
  0x80   :  { %v862_v15 = vpop.eup %861  ;;  %v712_v0 = vand.u32 2147483647, %v708_v9  ;;  %v574_v53 = vadd.f32 %v573_v31, %v572_v11  ;;  %v663_v21 = vadd.f32 %v662_v36, %v661_v43  ;;  %v727_v24 = vrot.slane %v726_v47, 4 }
  0x81   :  { %v310_v19 = vmul.f32 %v862_v15, %v1175_v10  ;;  %v312_v52 = vmul.f32 %v862_v15, %v1184_v35  ;;  %v516_v16 = vadd.f32 %v512_v33, %v508_v27  ;;  %v666_v61 = vadd.f32 %v665_v22, %v664_v46 }
  0x82   :  { %v719_v26 = vrot.slane %v711_v14, 1  ;;  %v584_v5 = vmul.f32 0.33333334, %v574_v53  ;;  %v679_v10 = vmul.f32 0.33333334, %v663_v21  ;;  %v728_v29 = vadd.f32 %v727_v24, %v726_v47 }
  0x83   :  { %v435_v30 = vrot.slane %v310_v19, 6  ;;  %v436_v28 = vrot.slane %v312_v52, 6  ;;  %520 = vst [vmem:[#allocation2 + $0x20] sm:$0xf] %v516_v16  ;;  %v667_v35 = vrot.slane %v666_v61, 2  ;;  %v720_v8 = vrot.slane %v712_v0, 1 }
  0x84   :  { %v864_v6 = vpop.eup %863  ;;  %v733_v51 = vsel %vm20_vm0, %v719_v26, 0.0  ;;  %v592_v62 = vmul.f32 %v588_v59, %v584_v5  ;;  %v687_v37 = vmul.f32 %v683_v63, %v679_v10  ;;  %v729_v13 = vrot.slane %v728_v29, 2 }
  0x85   :  { %v401_v34 = vmul.f32 %v864_v6, %v1198_v32  ;;  %v437_v12 = vsel %vm256_vm5, %v435_v30, %v436_v28  ;;  %v668_v40 = vadd.f32 %v667_v35, %v666_v61  ;;  %v734_v18 = vrot.slane %v733_v51, 4  ;;  %v760_v35 = vld [vmem:[%s1298_s0 + $0x30] sm:$0xf0] }
  0x86   :  { %v445_v38 = vadd.f32 %v437_v12, %v417_v60  ;;  %v596_v17 = vadd.f32 %v592_v62, %v588_v59  ;;  %v691_v25 = vadd.f32 %v687_v37, %v683_v63  ;;  %v740_v41 = vsel %vm20_vm0, %v720_v8, 0.0 }
  0x87   :  { %v453_v20 = vrot.slane %v401_v34, 1  ;;  %v669_v45 = vrot.slane %v668_v40, 1  ;;  %v730_v49 = vadd.f32 %v729_v13, %v728_v29  ;;  %v735_v1 = vadd.f32 %v734_v18, %v733_v51 }
  0x88   :  { %v741_v50 = vrot.slane %v740_v41, 4  ;;  %600 = vst [vmem:[#allocation2 + $0x20] sm:$0xf0] %v596_v17  ;;  %695 = vst [vmem:[#allocation2 + $0x18] sm:$0xf] %v691_v25 }
  0x89   :  { %v461_v48 = vadd.f32 %v453_v20, %v445_v38  ;;  %v670_v32 = vadd.f32 %v669_v45, %v668_v40  ;;  %v731_v54 = vrot.slane %v730_v49, 1  ;;  %v736_v55 = vrot.slane %v735_v1, 2 }
  0x8a   :  { %v742_v57 = vadd.f32 %v741_v50, %v740_v41 }
  0x8b   :  { %v465_v56 = vmul.f32 0.25, %v461_v48  ;;  %v680_v2 = vmul.f32 0.33333334, %v670_v32  ;;  %v732_v44 = vadd.f32 %v731_v54, %v730_v49  ;;  %v737_v27 = vadd.f32 %v736_v55, %v735_v1 }
  0x8c   :  { %v743_v60 = vrot.slane %v742_v57, 2 }
  0x8d   :  { %v469_v11 = vsub.f32 %v1193_v23, %v465_v56  ;;  %v529_v43 = vrot.slane %v465_v56, 5  ;;  %v605_v39 = vrot.slane %v465_v56, 2  ;;  %v701_v58 = vrot.slane %v465_v56, 7  ;;  %v759_v23 = vld [vmem:[%s1298_s0 + $0x18] sm:$0xf0] }
  0x8e   :  { %v688_v7 = vmul.f32 %v684_v3, %v680_v2  ;;  %v754_v9 = vmul.f32 0.33333334, %v732_v44  ;;  %v738_v31 = vrot.slane %v737_v27, 1  ;;  %v744_v36 = vadd.f32 %v743_v60, %v742_v57  ;;  %v509_v57 = vld [vmem:[%s1298_s0 + $0x28] sm:$0xf] }
  0x8f   :  { %v473_v46 = vand.u32 2147483647, %v469_v11  ;;  %v537_v14 = vsub.f32 %v1201_v42, %v529_v43  ;;  %v615_v15 = vsub.f32 %v310_v19, %v605_v39  ;;  %v617_v33 = vsub.f32 %v312_v52, %v605_v39  ;;  %v589_v39 = vld [vmem:[%s1298_s0 + $0x28] sm:$0xf0] }
  0x90   :  { %v692_v22 = vadd.f32 %v688_v7, %v684_v3  ;;  %v762_v47 = vmul.f32 %v758_v4, %v754_v9  ;;  %v739_v0 = vadd.f32 %v738_v31, %v737_v27  ;;  %v745_v53 = vrot.slane %v744_v36, 1  ;;  %v685_v31 = vld [vmem:[%s1298_s0 + $0x38] sm:$0xf] }
  0x91   :  { %v495_v21 = vsel %vm20_vm0, %v473_v46, 0.0  ;;  %v541_v16 = vand.u32 2147483647, %v537_v14  ;;  %v623_v59 = vand.u32 2147483647, %v615_v15  ;;  %v709_v63 = vsub.f32 %v401_v34, %v701_v58 }
  0x92   :  { %v496_v61 = vrot.slane %v495_v21, 4  ;;  %696 = vst [vmem:[#allocation2 + $0x30] sm:$0xf] %v692_v22  ;;  %v625_v24 = vand.u32 2147483647, %v617_v33  ;;  %v766_v26 = vadd.f32 %v762_v47, %v758_v4  ;;  %v746_v30 = vadd.f32 %v745_v53, %v744_v36 }
  0x93   :  { %v755_v42 = vmul.f32 0.33333334, %v739_v0  ;;  %v549_v19 = vrot.slane %v541_v16, 3  ;;  %v643_v52 = vrot.slane %v623_v59, 6  ;;  %v713_v28 = vand.u32 2147483647, %v709_v63 }
  0x94   :  { %v497_v5 = vadd.f32 %v496_v61, %v495_v21  ;;  %v644_v10 = vrot.slane %v625_v24, 6  ;;  %770 = vst [vmem:[#allocation2 + $0x10] sm:$0xf0] %v766_v26  ;;  %v756_v51 = vmul.f32 0.33333334, %v746_v30 }
  0x95   :  { %v763_v6 = vmul.f32 %v759_v23, %v755_v42  ;;  %v575_v29 = vsel %vm20_vm0, %v549_v19, 0.0  ;;  %v721_v8 = vrot.slane %v713_v28, 1  ;;  %v761_v36 = vld [vmem:[%s1298_s0 + $0x38] sm:$0xf0] }
  0x96   :  { %v498_v34 = vrot.slane %v497_v5, 2  ;;  %v576_v12 = vrot.slane %v575_v29, 4  ;;  %v645_v62 = vsel %vm256_vm5, %v643_v52, %v644_v10  ;;  %v764_v40 = vmul.f32 %v760_v35, %v756_v51 }
  0x97   :  { %v767_v37 = vadd.f32 %v763_v6, %v759_v23  ;;  %v671_v38 = vsel %vm20_vm0, %v645_v62, 0.0  ;;  %v747_v13 = vsel %vm20_vm0, %v721_v8, 0.0 }
  0x98   :  { %v499_v18 = vadd.f32 %v498_v34, %v497_v5  ;;  %v577_v20 = vadd.f32 %v576_v12, %v575_v29  ;;  %v672_v17 = vrot.slane %v671_v38, 4  ;;  %v748_v25 = vrot.slane %v747_v13, 4 }
  0x99   :  { %771 = vst [vmem:[#allocation2 + $0x18] sm:$0xf0] %v767_v37  ;;  %v768_v41 = vadd.f32 %v764_v40, %v760_v35 }
  0x9a   :  { %v500_v45 = vrot.slane %v499_v18, 1  ;;  %v578_v49 = vrot.slane %v577_v20, 2  ;;  %v673_v1 = vadd.f32 %v672_v17, %v671_v38  ;;  %v749_v50 = vadd.f32 %v748_v25, %v747_v13 }
  0x9b   :  { %772 = vst [vmem:[#allocation2 + $0x30] sm:$0xf0] %v768_v41 }
  0x9c   :  { %v501_v48 = vadd.f32 %v500_v45, %v499_v18  ;;  %v579_v32 = vadd.f32 %v578_v49, %v577_v20  ;;  %v674_v54 = vrot.slane %v673_v1, 2  ;;  %v750_v55 = vrot.slane %v749_v50, 2 }
  0x9e   :  { %v505_v56 = vmul.f32 0.33333334, %v501_v48  ;;  %v580_v3 = vrot.slane %v579_v32, 1  ;;  %v675_v2 = vadd.f32 %v674_v54, %v673_v1  ;;  %v751_v44 = vadd.f32 %v750_v55, %v749_v50 }
  0xa0   :  { %v513_v27 = vmul.f32 %v509_v57, %v505_v56  ;;  %v581_v60 = vadd.f32 %v580_v3, %v579_v32  ;;  %v676_v11 = vrot.slane %v675_v2, 1  ;;  %v752_v43 = vrot.slane %v751_v44, 1 }
  0xa2   :  { %v517_v4 = vadd.f32 %v513_v27, %v509_v57  ;;  %v585_v58 = vmul.f32 0.33333334, %v581_v60  ;;  %v677_v7 = vadd.f32 %v676_v11, %v675_v2  ;;  %v753_v9 = vadd.f32 %v752_v43, %v751_v44 }
  0xa4   :  { %521 = vst [vmem:[#allocation2 + $0x28] sm:$0xf] %v517_v4  ;;  %v593_v46 = vmul.f32 %v589_v39, %v585_v58  ;;  %v681_v14 = vmul.f32 0.33333334, %v677_v7  ;;  %v757_v15 = vmul.f32 0.33333334, %v753_v9 }
  0xa6   :  { %v597_v33 = vadd.f32 %v593_v46, %v589_v39  ;;  %v689_v22 = vmul.f32 %v685_v31, %v681_v14  ;;  %v765_v47 = vmul.f32 %v761_v36, %v757_v15 }
  0xa8   :  { %601 = vst [vmem:[#allocation2 + $0x28] sm:$0xf0] %v597_v33  ;;  %v693_v0 = vadd.f32 %v689_v22, %v685_v31  ;;  %v769_v23 = vadd.f32 %v765_v47, %v761_v36 }
  0xaa   :  { %697 = vst [vmem:[#allocation2 + $0x38] sm:$0xf] %v693_v0  ;;  %773 = vst [vmem:[#allocation2 + $0x38] sm:$0xf0] %v769_v23 }
  0xab   :  { %876 = shalt.err (!%p873_p4)
}
  0xac   :  { %s877_s3 = scalar_lea.hbm %s1300_s2, 1024 }
  0xad   :  { %p878_p5 = scmp.ne.s32.totalorder %s1300_s2, %s877_s3  ;;  %p881_p6 = scmp.lt.u32.totalorder %s877_s3, %s1300_s2 }
  0xaf   :  { %p883_p7 = pnand %p881_p6, %p878_p5 }
  0xb1   :  { %886 = shalt.err (!%p883_p7)
}
  0xb2   :  { %s890_s8 = smov 256   ;;  %s891_s9 = smov 16  }
  0xb3   :  { %785 = dma.vmem_to_hbm [thread:$0]  %s780_s28, 1024, %s1300_s2, [#allocation3], %s890_s8, %s890_s8, %s891_s9  }
  0xb4   :  { %887 = dma.done.wait [#allocation3], 1024  }
  0xb5   :  { %888 = vsyncadd [#allocation3], 4294966272 }
  0xb6   :  { %789 = vsyncpa [#allocation3], 1 }

</bundles_post_ra>
